<compile_context>
chip_gen: v5e
topology: v5e:2x2
jax: 0.10.0
libtpu: 0.0.40
codegen_flags: <defaults>
</compile_context>

<pallas_src>
import math

import jax
import jax.numpy as jnp
from jax.experimental import pallas as pl
from jax.experimental.pallas import tpu as pltpu


# --------------------------------------------------------------------------- #
# Kernel
# --------------------------------------------------------------------------- #
def _add_kernel(x_ref, v_ref, o_ref):
    # Elementwise add of one lane-dense tile on the VPU.  Any dtype cast of
    # the input happens in-kernel, hidden under the memory-bound add.
    o_ref[...] = x_ref[...].astype(o_ref.dtype) + v_ref[...].astype(o_ref.dtype)


# --------------------------------------------------------------------------- #
# Tiling heuristics
# --------------------------------------------------------------------------- #
_LANE_CANDIDATES = (4096, 2048, 1024, 512, 256, 128)

# ~6 MiB per array per pipeline buffer: 3 arrays x 2 buffers = 36 MiB of VMEM.
# Fits every generation (v5e/v6e 128 MiB physical, v7x 64 MiB) and is large
# enough to amortize the ~0.35us per-grid-step overhead at v7x's ~3.2 TB/s.
_TARGET_BLOCK_BYTES = 6 << 20
_VMEM_LIMIT_BYTES = 48 << 20  # legal headroom on v5e/v6e (128 MiB) and v7x (64 MiB)


def _sublane_multiple(dtype) -> int:
    """Packed sublane-tile multiple for a dtype: 8 (f32), 16 (bf16), 32 (int8/fp8)."""
    itemsize = jnp.dtype(dtype).itemsize
    return max(8, 32 // max(1, itemsize))


def _choose_2d_layout(total: int, sublane: int):
    """Pick a lane-dense (rows, lanes) factorization of `total`, or None."""
    # Pass 1: full vreg packing — rows >= sublane tile and a multiple of it
    # (unmasked vst, 100% sublane occupancy).
    for lanes in _LANE_CANDIDATES:
        if total % lanes == 0:
            rows = total // lanes
            if rows >= sublane and rows % sublane == 0:
                return rows, lanes
    # Pass 2: lane-aligned but short sublane extent; the block spans the full
    # row extent (legal "full array dim"), only sublane occupancy suffers.
    for lanes in _LANE_CANDIDATES:
        if total % lanes == 0:
            return total // lanes, lanes
    return None


def _is_traced(x) -> bool:
    try:
        return isinstance(x, jax.core.Tracer)
    except Exception:
        return False


# --------------------------------------------------------------------------- #
# Wrapper
# --------------------------------------------------------------------------- #
def _pallas_volume_add(input_volume, volume, *, donate_input: bool = False):
    """input_volume + volume via a lane-dense, large-block Pallas kernel."""
    assert input_volume.shape == volume.shape, (
        f"shape mismatch: {input_volume.shape} vs {volume.shape}"
    )
    orig_shape = volume.shape
    out_dtype = volume.dtype  # parameter dtype (float32); wider inputs are downcast
    total = int(math.prod(orig_shape))

    # Shared BlockSpec between input / volume / output: honor the strictest
    # packed sublane-tile requirement among the dtypes involved.
    sublane = max(_sublane_multiple(input_volume.dtype), _sublane_multiple(out_dtype))

    layout = _choose_2d_layout(total, sublane)
    if layout is not None:
        rows, lanes = layout
    else:
        # No divisor -> no padding/copies: keep the natural row-major layout.
        # The last dim equals the full array's last dim (always a legal block
        # extent, lane-masked stores only) and the fused leading dims are
        # tiled in sublane multiples with a masked edge block.
        lanes = orig_shape[-1]
        rows = total // lanes

    x2 = input_volume.reshape(rows, lanes)  # contiguous reshape: no copy
    v2 = volume.reshape(rows, lanes)

    # Block sizing: biggest sublane-aligned tile within the per-buffer budget.
    itemsize = max(jnp.dtype(input_volume.dtype).itemsize, jnp.dtype(out_dtype).itemsize)
    bytes_per_row = lanes * itemsize
    max_rows = max(sublane, (_TARGET_BLOCK_BYTES // bytes_per_row // sublane) * sublane)

    if rows <= max_rows:
        block_rows = rows  # full extent -> always a legal block
        # Megacore: if we can keep sublane alignment, split into >= 2 blocks so
        # the "parallel" grid axis shards across v7x's two TensorCores
        # (harmless on single-TC v5e/v6e).
        if rows >= 2 * sublane:
            half = -(-rows // 2)                       # ceil(rows / 2)
            block_rows = -(-half // sublane) * sublane  # round up to sublane tile
    else:
        block_rows = max_rows  # sublane multiple; edge block masked by Pallas
    grid_rows = pl.cdiv(rows, block_rows)

    spec = pl.BlockSpec((block_rows, lanes), lambda i: (i, 0))

    extra_kwargs = {}
    if donate_input and input_volume.dtype == out_dtype:
        # Caller explicitly donates input_volume's buffer: alias it with the
        # output to avoid a separate HBM output allocation.
        extra_kwargs["input_output_aliases"] = {0: 0}

    out2 = pl.pallas_call(
        _add_kernel,
        out_shape=jax.ShapeDtypeStruct((rows, lanes), out_dtype),
        grid=(grid_rows,),
        in_specs=[spec, spec],
        out_specs=spec,
        compiler_params=pltpu.CompilerParams(
            dimension_semantics=("parallel",),
            vmem_limit_bytes=_VMEM_LIMIT_BYTES,
        ),
        **extra_kwargs,
    )(x2, v2)

    return out2.reshape(orig_shape)


# --------------------------------------------------------------------------- #
# Module
# --------------------------------------------------------------------------- #
class VolumeModel:
    """JAX/Pallas re-implementation of the PyTorch VolumeModel forward pass."""

    def __init__(self, npix, num_slices, vol=None, fuse_when_traced=True):
        self.npix = npix
        self.num_slices = num_slices
        self.fuse_when_traced = fuse_when_traced
        if vol is None:
            # PyTorch init: zeros((num_slices, npix, npix))
            self.volume = jnp.zeros((num_slices, npix, npix), dtype=jnp.float32)
        else:
            self.volume = jnp.asarray(vol, dtype=jnp.float32)

    def __call__(self, input_volume, diff=True, donate_input=False):
        if not diff:
            # diff=False: output IS the internal (learnable) volume — no HBM
            # round-trip / kernel launch needed.
            return self.volume
        if self.fuse_when_traced and _is_traced(input_volume):
            # Inside a larger jit'd computation: emit a plain add so XLA can
            # fuse it into producer/consumer kernels instead of paying the
            # pallas_call fusion barrier plus a dedicated 3N-byte HBM pass.
            return input_volume + self.volume
        return _pallas_volume_add(input_volume, self.volume, donate_input=donate_input)


# --------------------------------------------------------------------------- #
# Self-test
# --------------------------------------------------------------------------- #
if __name__ == "__main__":
    key = jax.random.PRNGKey(0)
    k_vol, k_inp = jax.random.split(key)

    num_slices, npix = 4, 16

    # Deterministic non-trivial parameter volume (instead of zeros, so the add
    # path is actually exercised) and a deterministic input volume.
    init_vol = jax.random.normal(k_vol, (num_slices, npix, npix), dtype=jnp.float32)
    input_volume = jax.random.normal(k_inp, (num_slices, npix, npix), dtype=jnp.float32)

    model = VolumeModel(npix=npix, num_slices=num_slices, vol=init_vol)

    # diff=True path (hot path: lane-dense elementwise add in Pallas).
    out_diff = model(input_volume, diff=True)
    out_diff = jax.block_until_ready(out_diff)

    # diff=False path (returns the internal volume directly, no kernel).
    out_nodiff = model(input_volume, diff=False)
    out_nodiff = jax.block_until_ready(out_nodiff)

    # Non-128-divisible shape exercises the copy-free fallback tiling path.
    ns2, np2 = 3, 10
    vol2 = jax.random.normal(k_vol, (ns2, np2, np2), dtype=jnp.float32)
    inp2 = jax.random.normal(k_inp, (ns2, np2, np2), dtype=jnp.float32)
    model2 = VolumeModel(npix=np2, num_slices=ns2, vol=vol2)
    out2 = jax.block_until_ready(model2(inp2, diff=True))

    # Correctness checks vs pure-JAX reference.
    ref_diff = input_volume + init_vol
    assert out_diff.shape == (num_slices, npix, npix)
    assert out_diff.dtype == jnp.float32
    assert jnp.allclose(out_diff, ref_diff, atol=1e-6)
    assert jnp.allclose(out_nodiff, init_vol, atol=1e-6)
    assert jnp.allclose(out2, inp2 + vol2, atol=1e-6)

    print("KERNEL_OK")
</pallas_src>

<mosaic_0001>
module attributes {stable_mosaic.version = 11 : i64} {
  func.func @_add_kernel(%arg0: i32, %arg1: memref<8x128xf32, #tpu.memory_space<vmem>>, %arg2: memref<8x128xf32, #tpu.memory_space<vmem>>, %arg3: memref<8x128xf32, #tpu.memory_space<vmem>>) attributes {dimension_semantics = [#tpu.dimension_semantics<parallel>], iteration_bounds = array<i64: 1>, scalar_prefetch = 0 : i64, scratch_operands = 0 : i64, tpu.core_type = #tpu.core_type<tc>, window_params = [{transform_indices = @transform_0, window_bounds = array<i64: 8, 128>}, {transform_indices = @transform_1, window_bounds = array<i64: 8, 128>}, {transform_indices = @transform_2, window_bounds = array<i64: 8, 128>}]} {
    %c0 = arith.constant 0 : index
    %c0_0 = arith.constant 0 : index
    %0 = vector.load %arg1[%c0, %c0_0] : memref<8x128xf32, #tpu.memory_space<vmem>>, vector<8x128xf32>
    %c0_1 = arith.constant 0 : index
    %c0_2 = arith.constant 0 : index
    %1 = vector.load %arg2[%c0_1, %c0_2] : memref<8x128xf32, #tpu.memory_space<vmem>>, vector<8x128xf32>
    %2 = arith.addf %0, %1 : vector<8x128xf32>
    %c0_3 = arith.constant 0 : index
    %c0_4 = arith.constant 0 : index
    %3 = vector.load %arg3[%c0_3, %c0_4] : memref<8x128xf32, #tpu.memory_space<vmem>>, vector<8x128xf32>
    tpu.vector_store %arg3[%c0_3, %c0_4], %2 {strides = array<i32>} : memref<8x128xf32, #tpu.memory_space<vmem>>, vector<8x128xf32>,
    return
  }
  func.func @transform_0(%arg0: i32) -> (i32, i32) {
    %c0_i32 = arith.constant 0 : i32
    %c0_i32_0 = arith.constant 0 : i32
    return %arg0, %c0_i32 : i32, i32
  }
  func.func @transform_1(%arg0: i32) -> (i32, i32) {
    %c0_i32 = arith.constant 0 : i32
    %c0_i32_0 = arith.constant 0 : i32
    return %arg0, %c0_i32 : i32, i32
  }
  func.func @transform_2(%arg0: i32) -> (i32, i32) {
    %c0_i32 = arith.constant 0 : i32
    %c0_i32_0 = arith.constant 0 : i32
    return %arg0, %c0_i32 : i32, i32
  }
}

</mosaic_0001>

<bundles_post_ra>
// kernel: tpu_custom_call.1
= control target key start
LH: loop header
LB: loop body
LE: loop exit
PB: predicated region body
PF: predicated region fallthrough
CT: control target
= control target key end

     0   :  { %7 = vsyncpa [#allocation3], 0  ;;  %s170_s0 = inlined_call_operand.hbm [shape: f32[8,128], index: 0, kind: input, shape index: {}]   ;;  %s171_s1 = inlined_call_operand.hbm [shape: f32[8,128], index: 1, kind: input, shape index: {}]   ;;  %s172_s2 = inlined_call_operand.hbm [shape: f32[8,128], index: 2, kind: output, shape index: {}]  }
   0x1   :  { %8 = vsyncpa [#allocation6], 0 }
   0x2   :  { %9 = vsyncpa [#allocation4], 0  ;;  %s15_s11 = sshll.u32 %s170_s0, 4  ;;  %s143_s12 = smov [#allocation2]   ;;  %s16_s11 = int_to_ptr.hbm [resolvable:$true] %s15_s11 }
   0x3   :  { %s17_s13 = sshll.u32 %s143_s12, 4  ;;  %s26_s16 = sshll.u32 %s171_s1, 4  ;;  %s18_s13 = int_to_ptr.vmem [resolvable:$true] %s17_s13  ;;  %s27_s16 = int_to_ptr.hbm [resolvable:$true] %s26_s16 }
   0x4   :  { %20 = dma.hbm_to_vmem [thread:$0]  %s16_s11, 128, %s18_s13, [#allocation3]  }
   0x5   :  { %s144_s17 = smov [#allocation5]  }
   0x6   :  { %s28_s18 = sshll.u32 %s144_s17, 4  ;;  %s29_s18 = int_to_ptr.vmem [resolvable:$true] %s28_s18 }
   0x7   :  { %31 = dma.hbm_to_vmem [thread:$0]  %s27_s16, 128, %s29_s18, [#allocation6]  }
   0x8   :  { %137 = dma.done.wait [#allocation3], 128  }
   0x9   :  { %138 = vsyncadd [#allocation3], 4294967168 }
   0xa   :  { %139 = dma.done.wait [#allocation6], 128  }
   0xb   :  { %140 = vsyncadd [#allocation6], 4294967168  ;;  %s145_s19 = smov [#allocation7]   ;;  %s51_s22 = sshll.u32 %s172_s2, 4  ;;  %v40_v0 = vld [vmem:[#allocation2] sm:$0xff]  ;;  %v41_v1 = vld [vmem:[#allocation5] sm:$0xff]  ;;  %s52_s22 = int_to_ptr.hbm [resolvable:$true] %s51_s22 }
   0xc   :  { %s49_s0 = sshll.u32 %s145_s19, 4  ;;  %v42_v2 = vadd.f32 %v41_v1, %v40_v0  ;;  %s50_s0 = int_to_ptr.vmem [resolvable:$true] %s49_s0 }
   0xe   :  { %43 = vst [vmem:[#allocation7] sm:$0xff] %v42_v2 }
   0xf   :  { %54 = dma.vmem_to_hbm [thread:$0]  %s50_s0, 128, %s52_s22, [#allocation4]  }
  0x10   :  { %141 = dma.done.wait [#allocation4], 128  }
  0x11   :  { %142 = vsyncadd [#allocation4], 4294967168 }
  0x12   :  { %59 = vsyncpa [#allocation3], 1 }
  0x13   :  { %60 = vsyncpa [#allocation6], 1 }
  0x14   :  { %61 = vsyncpa [#allocation4], 1 }

</bundles_post_ra>
